<compile_context>
chip_gen: v5e
topology: v5e:2x2
jax: 0.10.0
libtpu: 0.0.40
codegen_flags: <defaults>
</compile_context>

<pallas_src>
import jax
import jax.numpy as jnp
from jax.experimental import pallas as pl
from jax.experimental.pallas import tpu as pltpu


def _round_up(x: int, m: int) -> int:
    return ((x + m - 1) // m) * m


def _guidance_embedder_kernel(g_ref, mask_ref, null_ref,
                              w1_ref, b1_ref, w2_ref, b2_ref,
                              out_ref, h_ref):
    # g_ref:    (TB, 10)   batch tile of guidance (f32)
    # mask_ref: (TB, 1)    f32, 1.0 where row is replaced by null_guidance
    # null_ref: (1, 10)    f32
    # w1_ref:   (10, Dp)   f32 or bf16 (PyTorch Linear weight, transposed)
    # b1_ref:   (1, Dp)    f32
    # w2_ref:   (Dp, TN)   f32 or bf16 (column tile of W2)
    # b2_ref:   (1, TN)    f32
    # out_ref:  (TB, TN)   f32
    # h_ref:    (TB, Dp)   f32 VMEM scratch holding relu(x@W1 + b1)

    # h depends only on the batch tile -> compute once per batch tile and reuse
    # across all output-column tiles.
    @pl.when(pl.program_id(1) == 0)
    def _():
        g = g_ref[...]
        # guidance[null_indices] = null_guidance  -> exact select semantics
        g = jnp.where(mask_ref[...] != 0.0, null_ref[...], g)        # (TB, 10)
        h = jnp.dot(g.astype(w1_ref.dtype), w1_ref[...],
                    preferred_element_type=jnp.float32) + b1_ref[...]
        h_ref[...] = jnp.maximum(h, 0.0)

    # l2: Linear(D -> D), column tile j
    y = jnp.dot(h_ref[...].astype(w2_ref.dtype), w2_ref[...],
                preferred_element_type=jnp.float32) + b2_ref[...]
    out_ref[...] = y.astype(out_ref.dtype)


def guidance_embedder_forward(guidance, mask, null_guidance,
                              w1, b1, w2, b2, *,
                              block_b: int = 512, block_n: int = 512):
    """guidance: (B, 10) f32, mask: (B,) bool -> (B, D) f32."""
    B, d_in = guidance.shape
    D = w1.shape[1]
    assert w2.shape == (D, D)
    assert block_b % 8 == 0 and block_n % 128 == 0

    # ---- lane-dense invariant: keep the embedding dim a multiple of 128 ----
    Dp = _round_up(D, 128)
    if Dp != D:
        w1 = jnp.pad(w1, ((0, 0), (0, Dp - D)))
        b1 = jnp.pad(b1, ((0, Dp - D),))
        w2 = jnp.pad(w2, ((0, Dp - D), (0, Dp - D)))
        b2 = jnp.pad(b2, ((0, Dp - D),))

    # ---- batch tiling: one exact-size tile for small B, big tiles otherwise ----
    Bp8 = _round_up(B, 8)
    if Bp8 <= block_b:
        TB, Bp = Bp8, Bp8                 # single grid step, no 128-tile padding
    else:
        TB = block_b
        Bp = _round_up(B, TB)
        # TODO(synk): for very large, non-tile-aligned B, write into a caller-
        # owned padded buffer instead of the pad + slice round trip below.
    nb = Bp // TB

    # ---- output-column tiling for the second matmul ----
    if Dp <= block_n:
        TN = Dp
    else:
        TN = block_n if Dp % block_n == 0 else (256 if Dp % 256 == 0 else 128)
    nn = Dp // TN

    mask_f = mask.astype(jnp.float32).reshape(B, 1)
    if Bp != B:
        guidance = jnp.pad(guidance, ((0, Bp - B), (0, 0)))
        mask_f = jnp.pad(mask_f, ((0, Bp - B), (0, 0)))

    null_2d = null_guidance.reshape(1, d_in).astype(jnp.float32)
    b1_2d = b1.reshape(1, Dp).astype(jnp.float32)
    b2_2d = b2.reshape(1, Dp).astype(jnp.float32)

    w_itemsize = jnp.dtype(w1.dtype).itemsize
    weight_bytes = w_itemsize * (d_in * Dp + Dp * Dp) + 4 * (2 * Dp + d_in)

    # Constant-index (fully resident) operands don't need double buffering;
    # only bother once the weight footprint is big enough to matter so the
    # small-shape path keeps the default (well-trodden) pipeline config.
    resident_mode = (pl.Buffered(buffer_count=1)
                     if weight_bytes > (4 << 20) else None)
    w2_mode = resident_mode if nn == 1 else None

    in_specs = [
        pl.BlockSpec((TB, d_in), lambda i, j: (i, 0)),                  # guidance
        pl.BlockSpec((TB, 1),    lambda i, j: (i, 0)),                  # mask
        pl.BlockSpec((1, d_in),  lambda i, j: (0, 0),
                     pipeline_mode=resident_mode),                      # null
        pl.BlockSpec((d_in, Dp), lambda i, j: (0, 0),
                     pipeline_mode=resident_mode),                      # w1
        pl.BlockSpec((1, Dp),    lambda i, j: (0, 0),
                     pipeline_mode=resident_mode),                      # b1
        pl.BlockSpec((Dp, TN),   lambda i, j: (0, j),
                     pipeline_mode=w2_mode),                            # w2 tile
        pl.BlockSpec((1, TN),    lambda i, j: (0, j),
                     pipeline_mode=w2_mode),                            # b2 tile
    ]
    out_spec = pl.BlockSpec((TB, TN), lambda i, j: (i, j))

    # Explicit scoped-VMEM limit only when we'd exceed v5e's 16 MiB default.
    act_buf_bytes = 2 * TB * (d_in + 1) * 4 + 2 * TB * TN * 4 + TB * Dp * 4
    w2_extra = (Dp * TN + TN) * w_itemsize if nn > 1 else 0
    vmem_needed = weight_bytes + act_buf_bytes + w2_extra
    vmem_limit = None
    if vmem_needed > (12 << 20):
        vmem_limit = int(min(96 << 20, vmem_needed * 3 // 2 + (1 << 20)))

    cost = pl.CostEstimate(
        flops=2 * Bp * Dp * (d_in + Dp),
        transcendentals=0,
        bytes_accessed=weight_bytes + 4 * (Bp * d_in + Bp + Bp * Dp),
    )

    out = pl.pallas_call(
        _guidance_embedder_kernel,
        out_shape=jax.ShapeDtypeStruct((Bp, Dp), jnp.float32),
        grid=(nb, nn),
        in_specs=in_specs,
        out_specs=out_spec,
        scratch_shapes=[pltpu.VMEM((TB, Dp), jnp.float32)],
        compiler_params=pltpu.CompilerParams(
            dimension_semantics=("parallel", "arbitrary"),
            vmem_limit_bytes=vmem_limit,
        ),
        cost_estimate=cost,
    )(guidance, mask_f, null_2d, w1, b1_2d, w2, b2_2d)

    if Bp != B or Dp != D:
        out = out[:B, :D]
    return out


def init_params(key, d_embedding, weight_dtype=jnp.float32):
    """Deterministic init matching nn.Linear shapes (weights pre-transposed)."""
    d_input = 10
    k1, k2, k3, k4 = jax.random.split(key, 4)
    lim1 = 1.0 / jnp.sqrt(d_input)
    lim2 = 1.0 / jnp.sqrt(d_embedding)
    w1 = jax.random.uniform(k1, (d_input, d_embedding), jnp.float32, -lim1, lim1)
    b1 = jax.random.uniform(k2, (d_embedding,), jnp.float32, -lim1, lim1)
    w2 = jax.random.uniform(k3, (d_embedding, d_embedding), jnp.float32, -lim2, lim2)
    b2 = jax.random.uniform(k4, (d_embedding,), jnp.float32, -lim2, lim2)
    null_guidance = jnp.zeros((d_input,), jnp.float32)  # nn.Parameter(t.zeros(10))
    return w1.astype(weight_dtype), b1, w2.astype(weight_dtype), b2, null_guidance


if __name__ == "__main__":
    B = 200               # not a multiple of 128; round_up(200, 8) == 200 -> single tile
    D_EMBEDDING = 128     # lane-dense output (multiple of 128)
    GUIDANCE_FREE_PROB = 0.1

    key = jax.random.PRNGKey(0)
    k_param, k_guid, k_mask = jax.random.split(key, 3)

    w1, b1, w2, b2, null_guidance = init_params(k_param, D_EMBEDDING)

    # guidance input (B, 10)
    guidance = jax.random.normal(k_guid, (B, 10), jnp.float32)

    # torch.rand(B) < guidance_free_prob  (deterministic here via PRNGKey(0))
    mask = jax.random.uniform(k_mask, (B,)) < GUIDANCE_FREE_PROB

    # reference in plain JAX
    g_sel = jnp.where(mask[:, None], null_guidance[None, :], guidance)
    ref = jnp.maximum(g_sel @ w1 + b1, 0.0) @ w2 + b2

    # 1) f32 weights, exact-size single batch tile: grid=(1, 1), no pad/slice.
    out = guidance_embedder_forward(guidance, mask, null_guidance, w1, b1, w2, b2)
    out = jax.block_until_ready(out)
    assert out.shape == (B, D_EMBEDDING)
    assert jnp.allclose(out, ref, atol=1e-5), "f32 kernel mismatch vs reference"

    # 2) bf16 weights (v6e/v7x MXU-native path) + small batch tile to exercise
    #    the multi-step / padded-batch path; accumulation stays f32.
    w1_bf16, w2_bf16 = w1.astype(jnp.bfloat16), w2.astype(jnp.bfloat16)
    out_bf16 = guidance_embedder_forward(guidance, mask, null_guidance,
                                         w1_bf16, b1, w2_bf16, b2, block_b=64)
    out_bf16 = jax.block_until_ready(out_bf16)
    assert out_bf16.shape == (B, D_EMBEDDING)
    assert jnp.allclose(out_bf16, ref, atol=5e-2, rtol=5e-2), "bf16 kernel mismatch"

    print("KERNEL_OK")
</pallas_src>

<mosaic_0001>
module attributes {stable_mosaic.version = 11 : i64} {
  func.func @_guidance_embedder_kernel(%arg0: i32, %arg1: i32, %arg2: memref<200x10xf32, #tpu.memory_space<vmem>>, %arg3: memref<200x1xf32, #tpu.memory_space<vmem>>, %arg4: memref<1x10xf32, #tpu.memory_space<vmem>>, %arg5: memref<10x128xf32, #tpu.memory_space<vmem>>, %arg6: memref<1x128xf32, #tpu.memory_space<vmem>>, %arg7: memref<128x128xf32, #tpu.memory_space<vmem>>, %arg8: memref<1x128xf32, #tpu.memory_space<vmem>>, %arg9: memref<200x128xf32, #tpu.memory_space<vmem>>, %arg10: memref<200x128xf32, #tpu.memory_space<vmem>>) attributes {dimension_semantics = [#tpu.dimension_semantics<parallel>, #tpu.dimension_semantics<arbitrary>], iteration_bounds = array<i64: 1, 1>, scalar_prefetch = 0 : i64, scratch_operands = 1 : i64, tpu.core_type = #tpu.core_type<tc>, window_params = [{transform_indices = @transform_0, window_bounds = array<i64: 200, 10>}, {transform_indices = @transform_1, window_bounds = array<i64: 200, 1>}, {pipeline_mode = #tpu.pipeline_mode<synchronous>, transform_indices = @transform_2, window_bounds = array<i64: 1, 10>}, {pipeline_mode = #tpu.pipeline_mode<synchronous>, transform_indices = @transform_3, window_bounds = array<i64: 10, 128>}, {pipeline_mode = #tpu.pipeline_mode<synchronous>, transform_indices = @transform_4, window_bounds = array<i64: 1, 128>}, {transform_indices = @transform_5, window_bounds = array<i64: 128, 128>}, {transform_indices = @transform_6, window_bounds = array<i64: 1, 128>}, {transform_indices = @transform_7, window_bounds = array<i64: 200, 128>}]} {
    %c0_i32 = arith.constant 0 : i32
    %0 = arith.cmpi eq, %arg1, %c0_i32 : i32
    %1 = arith.extui %0 : i1 to i32
    %c0_i32_0 = arith.constant 0 : i32
    %2 = arith.cmpi ne, %1, %c0_i32_0 : i32
    scf.if %2 {
      %c0_8 = arith.constant 0 : index
      %c0_9 = arith.constant 0 : index
      %10 = vector.load %arg2[%c0_8, %c0_9] : memref<200x10xf32, #tpu.memory_space<vmem>>, vector<200x10xf32>
      %c0_10 = arith.constant 0 : index
      %c0_11 = arith.constant 0 : index
      %11 = vector.load %arg3[%c0_10, %c0_11] : memref<200x1xf32, #tpu.memory_space<vmem>>, vector<200x1xf32>
      %cst_12 = arith.constant 0.000000e+00 : f32
      %12 = vector.broadcast %cst_12 : f32 to vector<200x1xf32>
      %13 = arith.cmpf one, %11, %12 : vector<200x1xf32>
      %c0_13 = arith.constant 0 : index
      %c0_14 = arith.constant 0 : index
      %14 = vector.load %arg4[%c0_13, %c0_14] : memref<1x10xf32, #tpu.memory_space<vmem>>, vector<1x10xf32>
      %15 = vector.shape_cast %13 : vector<200x1xi1> to vector<200x1xi1>
      %16 = vector.broadcast %15 : vector<200x1xi1> to vector<200x10xi1>
      %17 = vector.shape_cast %14 : vector<1x10xf32> to vector<1x10xf32>
      %18 = vector.broadcast %17 : vector<1x10xf32> to vector<200x10xf32>
      %19 = arith.select %16, %18, %10 : vector<200x10xi1>, vector<200x10xf32>
      %c0_15 = arith.constant 0 : index
      %c0_16 = arith.constant 0 : index
      %20 = vector.load %arg5[%c0_15, %c0_16] : memref<10x128xf32, #tpu.memory_space<vmem>>, vector<10x128xf32>
      %cst_17 = arith.constant dense<0.000000e+00> : vector<200x128xf32>
      %21 = tpu.matmul %19, %20, %cst_17 {dimension_numbers = #tpu.dot_dimension_numbers<[1], [0], [0], [1], [0, 0, 1, 1], [], []>} : vector<200x10xf32>, vector<10x128xf32>, vector<200x128xf32> -> vector<200x128xf32>
      %c0_18 = arith.constant 0 : index
      %c0_19 = arith.constant 0 : index
      %22 = vector.load %arg6[%c0_18, %c0_19] : memref<1x128xf32, #tpu.memory_space<vmem>>, vector<1x128xf32>
      %23 = vector.broadcast %22 : vector<1x128xf32> to vector<200x128xf32>
      %24 = arith.addf %21, %23 : vector<200x128xf32>
      %cst_20 = arith.constant 0.000000e+00 : f32
      %25 = vector.broadcast %cst_20 : f32 to vector<200x128xf32>
      %26 = arith.maximumf %24, %25 : vector<200x128xf32>
      %c0_21 = arith.constant 0 : index
      %c0_22 = arith.constant 0 : index
      %27 = vector.load %arg10[%c0_21, %c0_22] : memref<200x128xf32, #tpu.memory_space<vmem>>, vector<200x128xf32>
      tpu.vector_store %arg10[%c0_21, %c0_22], %26 {strides = array<i32>} : memref<200x128xf32, #tpu.memory_space<vmem>>, vector<200x128xf32>,
    } else {
    }
    %c0 = arith.constant 0 : index
    %c0_1 = arith.constant 0 : index
    %3 = vector.load %arg10[%c0, %c0_1] : memref<200x128xf32, #tpu.memory_space<vmem>>, vector<200x128xf32>
    %c0_2 = arith.constant 0 : index
    %c0_3 = arith.constant 0 : index
    %4 = vector.load %arg7[%c0_2, %c0_3] : memref<128x128xf32, #tpu.memory_space<vmem>>, vector<128x128xf32>
    %cst = arith.constant dense<0.000000e+00> : vector<200x128xf32>
    %5 = tpu.matmul %3, %4, %cst {dimension_numbers = #tpu.dot_dimension_numbers<[1], [0], [0], [1], [0, 0, 1, 1], [], []>} : vector<200x128xf32>, vector<128x128xf32>, vector<200x128xf32> -> vector<200x128xf32>
    %c0_4 = arith.constant 0 : index
    %c0_5 = arith.constant 0 : index
    %6 = vector.load %arg8[%c0_4, %c0_5] : memref<1x128xf32, #tpu.memory_space<vmem>>, vector<1x128xf32>
    %7 = vector.broadcast %6 : vector<1x128xf32> to vector<200x128xf32>
    %8 = arith.addf %5, %7 : vector<200x128xf32>
    %c0_6 = arith.constant 0 : index
    %c0_7 = arith.constant 0 : index
    %9 = vector.load %arg9[%c0_6, %c0_7] : memref<200x128xf32, #tpu.memory_space<vmem>>, vector<200x128xf32>
    tpu.vector_store %arg9[%c0_6, %c0_7], %8 {strides = array<i32>} : memref<200x128xf32, #tpu.memory_space<vmem>>, vector<200x128xf32>,
    return
  }
  func.func @transform_0(%arg0: i32, %arg1: i32) -> (i32, i32) {
    %c0_i32 = arith.constant 0 : i32
    %c0_i32_0 = arith.constant 0 : i32
    return %arg0, %c0_i32 : i32, i32
  }
  func.func @transform_1(%arg0: i32, %arg1: i32) -> (i32, i32) {
    %c0_i32 = arith.constant 0 : i32
    %c0_i32_0 = arith.constant 0 : i32
    return %arg0, %c0_i32 : i32, i32
  }
  func.func @transform_2(%arg0: i32, %arg1: i32) -> (i32, i32) {
    %c0_i32 = arith.constant 0 : i32
    %c0_i32_0 = arith.constant 0 : i32
    %c0_i32_1 = arith.constant 0 : i32
    return %c0_i32, %c0_i32_0 : i32, i32
  }
  func.func @transform_3(%arg0: i32, %arg1: i32) -> (i32, i32) {
    %c0_i32 = arith.constant 0 : i32
    %c0_i32_0 = arith.constant 0 : i32
    %c0_i32_1 = arith.constant 0 : i32
    return %c0_i32, %c0_i32_0 : i32, i32
  }
  func.func @transform_4(%arg0: i32, %arg1: i32) -> (i32, i32) {
    %c0_i32 = arith.constant 0 : i32
    %c0_i32_0 = arith.constant 0 : i32
    %c0_i32_1 = arith.constant 0 : i32
    return %c0_i32, %c0_i32_0 : i32, i32
  }
  func.func @transform_5(%arg0: i32, %arg1: i32) -> (i32, i32) {
    %c0_i32 = arith.constant 0 : i32
    %c0_i32_0 = arith.constant 0 : i32
    return %c0_i32, %arg1 : i32, i32
  }
  func.func @transform_6(%arg0: i32, %arg1: i32) -> (i32, i32) {
    %c0_i32 = arith.constant 0 : i32
    %c0_i32_0 = arith.constant 0 : i32
    return %c0_i32, %arg1 : i32, i32
  }
  func.func @transform_7(%arg0: i32, %arg1: i32) -> (i32, i32) {
    %c0_i32 = arith.constant 0 : i32
    return %arg0, %arg1 : i32, i32
  }
}

</mosaic_0001>

<bundles_post_ra>
// kernel: tpu_custom_call.1
= control target key start
LH: loop header
LB: loop body
LE: loop exit
PB: predicated region body
PF: predicated region fallthrough
CT: control target
= control target key end

     0   :  { %v764_v3 = vmov 0   ;;  %s1179_s0 = inlined_call_operand.vmem [shape: f32[200,10], index: 0, kind: input, shape index: {}]   ;;  %s1180_s1 = inlined_call_operand.vmem [shape: f32[200,1], index: 1, kind: input, shape index: {}]   ;;  %s1181_s2 = inlined_call_operand.vmem [shape: f32[1,10], index: 2, kind: input, shape index: {}]   ;;  %s1182_s3 = inlined_call_operand.vmem [shape: f32[10,128], index: 3, kind: input, shape index: {}]   ;;  %s1183_s4 = inlined_call_operand.vmem [shape: f32[1,128], index: 4, kind: input, shape index: {}]   ;;  %s1184_s5 = inlined_call_operand.vmem [shape: f32[128,128], index: 5, kind: input, shape index: {}]   ;;  %s1185_s6 = inlined_call_operand.vmem [shape: f32[1,128], index: 6, kind: input, shape index: {}]   ;;  %s1186_s7 = inlined_call_operand.hbm [shape: f32[200,128], index: 7, kind: output, shape index: {}]  }
   0x1   :  { %v60_v0 = vld [vmem:[%s1180_s1 + $0x20] sm:$0xff]  ;;  %v58_v1 = vld [vmem:[%s1180_s1 + $0x10] sm:$0xff]  ;;  %734 = vset.pattern.permute.xlu2 %v764_v3  ;;  %733 = vset.pattern.permute.xlu1 %v764_v3  ;;  %v61_v7 = vld [vmem:[%s1180_s1 + $0x28] sm:$0xff] }
   0x2   :  { %v56_v2 = vld [vmem:[%s1180_s1] sm:$0xff]  ;;  %vm85_vm0 = vcmp.ne.f32.partialorder %v60_v0, 0.0  ;;  %vm83_vm1 = vcmp.ne.f32.partialorder %v58_v1, 0.0  ;;  %732 = vset.pattern.permute.xlu0 %v764_v3  ;;  %v59_v8 = vld [vmem:[%s1180_s1 + $0x18] sm:$0xff]  ;;  %v57_v9 = vld [vmem:[%s1180_s1 + $0x8] sm:$0xff]  ;;  %vm86_vm3 = vcmp.ne.f32.partialorder %v61_v7, 0.0 }
   0x3   :  { %vm81_vm2 = vcmp.ne.f32.partialorder %v56_v2, 0.0  ;;  %v111_v4 = vsel %vm85_vm0, 1, %v764_v3  ;;  %v109_v5 = vsel %vm83_vm1, 1, %v764_v3  ;;  %vm84_vm4 = vcmp.ne.f32.partialorder %v59_v8, 0.0  ;;  %v64_v13 = vld [vmem:[%s1180_s1 + $0x40] sm:$0xff]  ;;  %v63_v14 = vld [vmem:[%s1180_s1 + $0x38] sm:$0xff] }
   0x4   :  { %v107_v6 = vsel %vm81_vm2, 1, %v764_v3  ;;  %145 = vperm.xlu2 %734, %v111_v4   ;;  %139 = vperm.xlu1 %733, %v109_v5   ;;  %vm82_vm5 = vcmp.ne.f32.partialorder %v57_v9, 0.0  ;;  %v112_v10 = vsel %vm86_vm3, 1, %v764_v3  ;;  %v110_v11 = vsel %vm84_vm4, 1, %v764_v3 }
   0x5   :  { %133 = vperm.xlu0 %732, %v107_v6   ;;  %v108_v12 = vsel %vm82_vm5, 1, %v764_v3 }
   0x6   :  { %12 = vsyncpa [#allocation4], 0  ;;  %v62_v15 = vld [vmem:[%s1180_s1 + $0x30] sm:$0xff]  ;;  %vm89_vm6 = vcmp.ne.f32.partialorder %v64_v13, 0.0  ;;  %vm88_vm7 = vcmp.ne.f32.partialorder %v63_v14, 0.0  ;;  %v67_v19 = vld [vmem:[%s1180_s1 + $0x58] sm:$0xff] }
   0x7   :  { %vm87_vm8 = vcmp.ne.f32.partialorder %v62_v15, 0.0  ;;  %v115_v16 = vsel %vm89_vm6, 1, %v764_v3  ;;  %v114_v17 = vsel %vm88_vm7, 1, %v764_v3  ;;  %v66_v20 = vld [vmem:[%s1180_s1 + $0x50] sm:$0xff]  ;;  %v65_v21 = vld [vmem:[%s1180_s1 + $0x48] sm:$0xff]  ;;  %vm92_vm9 = vcmp.ne.f32.partialorder %v67_v19, 0.0 }
   0x8   :  { %v113_v18 = vsel %vm87_vm8, 1, %v764_v3  ;;  %vm91_vm10 = vcmp.ne.f32.partialorder %v66_v20, 0.0  ;;  %vm90_vm11 = vcmp.ne.f32.partialorder %v65_v21, 0.0  ;;  %v118_v22 = vsel %vm92_vm9, 1, %v764_v3  ;;  %v72_v25 = vld [vmem:[%s1180_s1 + $0x80] sm:$0xff]  ;;  %v71_v27 = vld [vmem:[%s1180_s1 + $0x78] sm:$0xff] }
   0x9   :  { %v117_v23 = vsel %vm91_vm10, 1, %v764_v3  ;;  %v116_v24 = vsel %vm90_vm11, 1, %v764_v3  ;;  %v68_v26 = vld [vmem:[%s1180_s1 + $0x60] sm:$0xff]  ;;  %vm97_vm12 = vcmp.ne.f32.partialorder %v72_v25, 0.0  ;;  %vm96_vm14 = vcmp.ne.f32.partialorder %v71_v27, 0.0  ;;  %v70_v31 = vld [vmem:[%s1180_s1 + $0x70] sm:$0xff] }
   0xa   :  { %vm93_vm13 = vcmp.ne.f32.partialorder %v68_v26, 0.0  ;;  %v123_v28 = vsel %vm97_vm12, 1, %v764_v3  ;;  %v122_v30 = vsel %vm96_vm14, 1, %v764_v3  ;;  %v73_v32 = vld [vmem:[%s1180_s1 + $0x88] sm:$0xff]  ;;  %vm95_vm15 = vcmp.ne.f32.partialorder %v70_v31, 0.0  ;;  %v76_v37 = vld [vmem:[%s1180_s1 + $0xa0] sm:$0xff] }
   0xb   :  { %v119_v29 = vsel %vm93_vm13, 1, %v764_v3  ;;  %v69_v33 = vld [vmem:[%s1180_s1 + $0x68] sm:$0xff]  ;;  %vm98_vm0 = vcmp.ne.f32.partialorder %v73_v32, 0.0  ;;  %v121_v34 = vsel %vm95_vm15, 1, %v764_v3  ;;  %v75_v38 = vld [vmem:[%s1180_s1 + $0x98] sm:$0xff]  ;;  %v74_v39 = vld [vmem:[%s1180_s1 + $0x90] sm:$0xff] }
   0xc   :  { %148 = vperm.xlu2 %734, %v112_v10   ;;  %142 = vperm.xlu1 %733, %v110_v11   ;;  %vm94_vm1 = vcmp.ne.f32.partialorder %v69_v33, 0.0  ;;  %v124_v35 = vsel %vm98_vm0, 1, %v764_v3  ;;  %vm101_vm2 = vcmp.ne.f32.partialorder %v76_v37, 0.0  ;;  %vm100_vm3 = vcmp.ne.f32.partialorder %v75_v38, 0.0  ;;  %v79_v43 = vld [vmem:[%s1180_s1 + $0xb8] sm:$0xff]  ;;  %v78_v44 = vld [vmem:[%s1180_s1 + $0xb0] sm:$0xff] }
   0xd   :  { %136 = vperm.xlu0 %732, %v108_v12   ;;  %v120_v36 = vsel %vm94_vm1, 1, %v764_v3  ;;  %vm99_vm4 = vcmp.ne.f32.partialorder %v74_v39, 0.0  ;;  %v127_v40 = vsel %vm101_vm2, 1, %v764_v3  ;;  %v126_v41 = vsel %vm100_vm3, 1, %v764_v3  ;;  %v77_v45 = vld [vmem:[%s1180_s1 + $0xa8] sm:$0xff]  ;;  %v80_v49 = vld [vmem:[%s1180_s1 + $0xc0] sm:$0xff] }
   0xe   :  { %v125_v42 = vsel %vm99_vm4, 1, %v764_v3  ;;  %vm104_vm5 = vcmp.ne.f32.partialorder %v79_v43, 0.0  ;;  %vm103_vm6 = vcmp.ne.f32.partialorder %v78_v44, 0.0  ;;  %vm102_vm7 = vcmp.ne.f32.partialorder %v77_v45, 0.0  ;;  %v261_v51 = vld [vmem:[%s1182_s3 + $0x8] sm:$0x3] }
   0xf   :  { %v130_v46 = vsel %vm104_vm5, 1, %v764_v3  ;;  %v129_v47 = vsel %vm103_vm6, 1, %v764_v3  ;;  %v128_v48 = vsel %vm102_vm7, 1, %v764_v3  ;;  %vm105_vm8 = vcmp.ne.f32.partialorder %v80_v49, 0.0  ;;  %v260_v52 = vld [vmem:[%s1182_s3] sm:$0xff]  ;;  %v32_v60 = vld [vmem:[%s1179_s0 + $0x8] sm:$0xff] }
  0x10   :  { %v131_v50 = vsel %vm105_vm8, 1, %v764_v3  ;;  %vm342_vm9 = vcmask 1041408   ;;  %v920_v54 = vld [vmem:[%s1181_s2] ss:$0 sm:$0xff]  ;;  %vm266_vm10 = vcmask 80896   ;;  %v33_v0 = vld [vmem:[%s1179_s0 + $0x10] sm:$0xff] }
  0x11   :  { %668 = vmatpush.msk.msra.mxu0 %vm342_vm9, %v261_v51  ;;  %694 = vmatpush.msk.msra.mxu3 %vm342_vm9, %v261_v51  ;;  %v31_v56 = vld [vmem:[%s1179_s0] sm:$0xff]  ;;  %v34_v5 = vld [vmem:[%s1179_s0 + $0x18] sm:$0xff]  ;;  %v527_v39 = vld [vmem:[%s1184_s5 + $0x70] sm:$0xff]  ;;  %s656_s16 = sshll.u32 %s1186_s7, 4  ;;  %s766_s17 = smov 128   ;;  %s657_s16 = int_to_ptr.hbm [resolvable:$true] %s656_s16 }
  0x12   :  { %v35_v10 = vld [vmem:[%s1179_s0 + $0x20] sm:$0xff]  ;;  %v46_v11 = vld [vmem:[%s1179_s0 + $0x78] sm:$0xff]  ;;  %v523_v49 = vld [vmem:[%s1184_s5 + $0x50] sm:$0xff]  ;;  %s767_s18 = smov 8  }
  0x13   :  { %361 = vmatpush.msra.mxu0 %v260_v52  ;;  %695 = vmatpush.msra.mxu3 %v260_v52  ;;  %v528_v38 = vld [vmem:[%s1184_s5 + $0x78] sm:$0xff]  ;;  %v51_v43 = vld [vmem:[%s1179_s0 + $0xa0] sm:$0xff]  ;;  %v52_v51 = vld [vmem:[%s1179_s0 + $0xa8] sm:$0xff] }
  0x14   :  { %157 = vperm.xlu2 %734, %v115_v16   ;;  %154 = vperm.xlu1 %733, %v114_v17   ;;  %v36_v17 = vld [vmem:[%s1179_s0 + $0x28] sm:$0xff] }
  0x15   :  { %151 = vperm.xlu0 %732, %v113_v18   ;;  %v47_v18 = vld [vmem:[%s1179_s0 + $0x80] sm:$0xff]  ;;  %533 = vmatpush.msra.mxu1 %v528_v38  ;;  %v522_v52 = vld [vmem:[%s1184_s5 + $0x48] sm:$0xff] }
  0x16   :  { %696 = vmatpush.msra.mxu2 %v528_v38  ;;  %697 = vmatpush.msrb.mxu3 %v528_v38 }
  0x17   :  { %534 = vmatpush.msra.mxu1 %v527_v39 }
  0x18   :  { %698 = vmatpush.msra.mxu2 %v527_v39  ;;  %699 = vmatpush.msrb.mxu3 %v527_v39 }
  0x1c   :  { %166 = vperm.xlu2 %734, %v118_v22   ;;  %163 = vperm.xlu1 %733, %v117_v23   ;;  %v37_v23 = vld [vmem:[%s1179_s0 + $0x30] sm:$0xff] }
  0x1d   :  { %160 = vperm.xlu0 %732, %v116_v24   ;;  %v48_v24 = vld [vmem:[%s1179_s0 + $0x88] sm:$0xff] }
  0x24   :  { %181 = vperm.xlu2 %734, %v123_v28   ;;  %169 = vperm.xlu1 %733, %v119_v29   ;;  %v38_v28 = vld [vmem:[%s1179_s0 + $0x38] sm:$0xff]  ;;  %v49_v29 = vld [vmem:[%s1179_s0 + $0x90] sm:$0xff] }
  0x25   :  { %178 = vperm.xlu0 %732, %v122_v30  }
  0x2c   :  { %175 = vperm.xlu2 %734, %v121_v34   ;;  %184 = vperm.xlu1 %733, %v124_v35   ;;  %v39_v34 = vld [vmem:[%s1179_s0 + $0x40] sm:$0xff]  ;;  %v50_v35 = vld [vmem:[%s1179_s0 + $0x98] sm:$0xff] }
  0x2d   :  { %172 = vperm.xlu0 %732, %v120_v36  }
  0x34   :  { %193 = vperm.xlu2 %734, %v127_v40   ;;  %190 = vperm.xlu1 %733, %v126_v41   ;;  %v526_v40 = vld [vmem:[%s1184_s5 + $0x68] sm:$0xff] }
  0x35   :  { %187 = vperm.xlu0 %732, %v125_v42   ;;  %v40_v42 = vld [vmem:[%s1179_s0 + $0x48] sm:$0xff]  ;;  %535 = vmatpush.msra.mxu1 %v526_v40 }
  0x36   :  { %700 = vmatpush.msra.mxu2 %v526_v40  ;;  %701 = vmatpush.msrb.mxu3 %v526_v40 }
  0x3c   :  { %202 = vperm.xlu2 %734, %v130_v46   ;;  %199 = vperm.xlu1 %733, %v129_v47   ;;  %v525_v46 = vld [vmem:[%s1184_s5 + $0x60] sm:$0xff]  ;;  %v524_v47 = vld [vmem:[%s1184_s5 + $0x58] sm:$0xff] }
  0x3d   :  { %196 = vperm.xlu0 %732, %v128_v48   ;;  %536 = vmatpush.msra.mxu1 %v525_v46 }
  0x3e   :  { %702 = vmatpush.msra.mxu2 %v525_v46  ;;  %703 = vmatpush.msrb.mxu3 %v525_v46 }
  0x3f   :  { %537 = vmatpush.msra.mxu1 %v524_v47 }
  0x40   :  { %704 = vmatpush.msra.mxu2 %v524_v47  ;;  %705 = vmatpush.msrb.mxu3 %v524_v47 }
  0x41   :  { %538 = vmatpush.msra.mxu1 %v523_v49 }
  0x42   :  { %706 = vmatpush.msra.mxu2 %v523_v49  ;;  %707 = vmatpush.msrb.mxu3 %v523_v49 }
  0x43   :  { %539 = vmatpush.msra.mxu1 %v522_v52 }
  0x44   :  { %708 = vmatpush.msra.mxu2 %v522_v52  ;;  %709 = vmatpush.msrb.mxu3 %v522_v52 }
  0x45   :  { %205 = vperm.xlu0 %732, %v131_v50   ;;  %v41_v50 = vld [vmem:[%s1179_s0 + $0x50] sm:$0xff] }
  0x5e   :  { %v146_v53 = vpop.permute.xlu2 %145 }
  0x5f   :  { %vm211_vm15 = vcmp.eq.s32.totalorder %v146_v53, 1 }
  0x60   :  { %v239_v13 = vsel %vm211_vm15, %v920_v54, %v35_v10  ;;  %v513_v10 = vld [vmem:[%s1184_s5] sm:$0xff] }
  0x66   :  { %v149_v61 = vpop.permute.xlu2 %148 }
  0x67   :  { %vm212_vm1 = vcmp.eq.s32.totalorder %v149_v61, 1  ;;  %v53_v61 = vld [vmem:[%s1179_s0 + $0xb0] sm:$0xff] }
  0x68   :  { %v240_v20 = vsel %vm212_vm1, %v920_v54, %v36_v17 }
  0x6e   :  { %v158_v4 = vpop.permute.xlu2 %157 }
  0x6f   :  { %vm215_vm7 = vcmp.eq.s32.totalorder %v158_v4, 1  ;;  %v43_v4 = vld [vmem:[%s1179_s0 + $0x60] sm:$0xff] }
  0x70   :  { %v243_v36 = vsel %vm215_vm7, %v920_v54, %v39_v34 }
  0x76   :  { %v140_v55 = vpop.permute.xlu1 %139  ;;  %v946_v9 = vpop.permute.xlu2 %166 }
  0x77   :  { %v134_v57 = vpop.permute.xlu0 %133  ;;  %vm209_vm13 = vcmp.eq.s32.totalorder %v140_v55, 1 }
  0x78   :  { %vm207_vm11 = vcmp.eq.s32.totalorder %v134_v57, 1  ;;  %v237_v3 = vsel %vm209_vm13, %v920_v54, %v33_v0  ;;  %v520_v57 = vld [vmem:[%s1184_s5 + $0x38] sm:$0xff] }
  0x79   :  { %v235_v58 = vsel %vm207_vm11, %v920_v54, %v31_v56  ;;  %v521_v56 = vld [vmem:[%s1184_s5 + $0x40] sm:$0xff] }
  0x7a   :  { %669 = vmatmul.msk.f32.vlgmr.msra.gmra.mxu0 %vm266_vm10, %v235_v58  ;;  %540 = vmatpush.msra.mxu1 %v521_v56 }
  0x7b   :  { %710 = vmatpush.msra.mxu2 %v521_v56  ;;  %711 = vmatpush.msrb.mxu3 %v521_v56 }
  0x7c   :  { %541 = vmatpush.msra.mxu1 %v520_v57 }
  0x7d   :  { %712 = vmatpush.msra.mxu2 %v520_v57  ;;  %713 = vmatpush.msrb.mxu3 %v520_v57 }
  0x7e   :  { %v143_v59 = vpop.permute.xlu1 %142  ;;  %v182_v16 = vpop.permute.xlu2 %181 }
  0x7f   :  { %v137_v62 = vpop.permute.xlu0 %136  ;;  %vm210_vm14 = vcmp.eq.s32.totalorder %v143_v59, 1  ;;  %vm223_vm2 = vcmp.eq.s32.totalorder %v182_v16, 1  ;;  %v519_v59 = vld [vmem:[%s1184_s5 + $0x30] sm:$0xff] }
  0x80   :  { %vm208_vm12 = vcmp.eq.s32.totalorder %v137_v62, 1  ;;  %v238_v8 = vsel %vm210_vm14, %v920_v54, %v34_v5  ;;  %v251_v21 = vsel %vm223_vm2, %v920_v54, %v47_v18  ;;  %vm218_vm14 = vcmp.eq.s32.totalorder %v946_v9, 1  ;;  %v518_v62 = vld [vmem:[%s1184_s5 + $0x28] sm:$0xff]  ;;  %542 = vmatpush.msra.mxu1 %v519_v59  ;;  %714 = vmatpush.msra.mxu2 %v519_v59  ;;  %v54_v5 = vld [vmem:[%s1179_s0 + $0xb8] sm:$0xff]  ;;  %v45_v16 = vld [vmem:[%s1179_s0 + $0x70] sm:$0xff] }
  0x81   :  { %v236_v63 = vsel %vm208_vm12, %v920_v54, %v32_v60  ;;  %v42_v60 = vld [vmem:[%s1179_s0 + $0x58] sm:$0xff]  ;;  %715 = vmatpush.msrb.mxu3 %v519_v59  ;;  %v1116_v18 = vld [vmem:[%s1183_s4] ss:$0 sm:$0xff] }
  0x82   :  { %670 = vmatmul.msk.f32.gmra.mxu0 %vm266_vm10, %v236_v63  ;;  %v517_v63 = vld [vmem:[%s1184_s5 + $0x20] sm:$0xff]  ;;  %v246_v0 = vsel %vm218_vm14, %v920_v54, %v42_v60  ;;  %543 = vmatpush.msra.mxu1 %v518_v62 }
  0x83   :  { %716 = vmatpush.msra.mxu2 %v518_v62  ;;  %717 = vmatpush.msrb.mxu3 %v518_v62 }
  0x84   :  { %544 = vmatpush.msra.mxu1 %v517_v63 }
  0x85   :  { %718 = vmatpush.msra.mxu2 %v517_v63  ;;  %719 = vmatpush.msrb.mxu3 %v517_v63 }
  0x86   :  { %v155_v1 = vpop.permute.xlu1 %154  ;;  %v992_v32 = vpop.permute.xlu2 %175 }
  0x87   :  { %v152_v2 = vpop.permute.xlu0 %151  ;;  %vm214_vm5 = vcmp.eq.s32.totalorder %v155_v1, 1 }
  0x88   :  { %vm213_vm3 = vcmp.eq.s32.totalorder %v152_v2, 1  ;;  %v242_v30 = vsel %vm214_vm5, %v920_v54, %v38_v28  ;;  %v516_v2 = vld [vmem:[%s1184_s5 + $0x18] sm:$0xff] }
  0x89   :  { %v241_v25 = vsel %vm213_vm3, %v920_v54, %v37_v23  ;;  %545 = vmatpush.msra.mxu1 %v516_v2  ;;  %720 = vmatpush.msra.mxu2 %v516_v2 }
  0x8a   :  { %671 = vmatmul.msk.f32.gmra.mxu0 %vm266_vm10, %v237_v3  ;;  %721 = vmatpush.msrb.mxu3 %v516_v2 }
  0x8e   :  { %v940_v6 = vpop.permute.xlu1 %163  ;;  %v194_v41 = vpop.permute.xlu2 %193 }
  0x8f   :  { %v942_v7 = vpop.permute.xlu0 %160  ;;  %vm227_vm9 = vcmp.eq.s32.totalorder %v194_v41, 1  ;;  %vm217_vm12 = vcmp.eq.s32.totalorder %v940_v6, 1  ;;  %v515_v6 = vld [vmem:[%s1184_s5 + $0x10] sm:$0xff] }
  0x90   :  { %vm216_vm11 = vcmp.eq.s32.totalorder %v942_v7, 1  ;;  %v255_v45 = vsel %vm227_vm9, %v920_v54, %v51_v43  ;;  %v245_v53 = vsel %vm217_vm12, %v920_v54, %v41_v50  ;;  %546 = vmatpush.msra.mxu1 %v515_v6  ;;  %722 = vmatpush.msra.mxu2 %v515_v6  ;;  %v514_v7 = vld [vmem:[%s1184_s5 + $0x8] sm:$0xff] }
  0x91   :  { %v244_v44 = vsel %vm216_vm11, %v920_v54, %v40_v42  ;;  %723 = vmatpush.msrb.mxu3 %v515_v6 }
  0x92   :  { %672 = vmatmul.msk.f32.gmra.mxu0 %vm266_vm10, %v238_v8  ;;  %547 = vmatpush.msra.mxu1 %v514_v7 }
  0x93   :  { %724 = vmatpush.msra.mxu2 %v514_v7  ;;  %725 = vmatpush.msrb.mxu3 %v514_v7 }
  0x94   :  { %548 = vmatpush.msra.mxu1 %v513_v10 }
  0x95   :  { %726 = vmatpush.msra.mxu2 %v513_v10  ;;  %727 = vmatpush.msrb.mxu3 %v513_v10 }
  0x96   :  { %v955_v14 = vpop.permute.xlu1 %169  ;;  %v203_v3 = vpop.permute.xlu2 %202 }
  0x97   :  { %v179_v12 = vpop.permute.xlu0 %178  ;;  %vm219_vm1 = vcmp.eq.s32.totalorder %v955_v14, 1 }
  0x98   :  { %vm222_vm0 = vcmp.eq.s32.totalorder %v179_v12, 1  ;;  %v247_v8 = vsel %vm219_vm1, %v920_v54, %v43_v4  ;;  %v44_v12 = vld [vmem:[%s1179_s0 + $0x68] sm:$0xff] }
  0x99   :  { %v250_v15 = vsel %vm222_vm0, %v920_v54, %v46_v11  ;;  %vm230_vm0 = vcmp.eq.s32.totalorder %v203_v3, 1 }
  0x9a   :  { %673 = vmatmul.msk.f32.gmra.mxu0 %vm266_vm10, %v239_v13  ;;  %684 = vmatmul.msk.f32.vlgmr.msra.gmra.mxu3 %vm266_vm10, %v250_v15  ;;  %v258_v9 = vsel %vm230_vm0, %v920_v54, %v54_v5  ;;  %v55_v13 = vld [vmem:[%s1179_s0 + $0xc0] sm:$0xff] }
  0x9e   :  { %v185_v22 = vpop.permute.xlu1 %184 }
  0x9f   :  { %v966_v19 = vpop.permute.xlu0 %172  ;;  %vm224_vm4 = vcmp.eq.s32.totalorder %v185_v22, 1 }
  0xa0   :  { %v252_v26 = vsel %vm224_vm4, %v920_v54, %v48_v24  ;;  %vm220_vm2 = vcmp.eq.s32.totalorder %v966_v19, 1  ;;  %vm221_vm4 = vcmp.eq.s32.totalorder %v992_v32, 1 }
  0xa1   :  { %v248_v14 = vsel %vm220_vm2, %v920_v54, %v44_v12  ;;  %v249_v17 = vsel %vm221_vm4, %v920_v54, %v45_v16 }
  0xa2   :  { %674 = vmatmul.msk.f32.gmra.mxu0 %vm266_vm10, %v240_v20  ;;  %685 = vmatmul.msk.f32.gmra.mxu3 %vm266_vm10, %v251_v21 }
  0xa6   :  { %v191_v33 = vpop.permute.xlu1 %190 }
  0xa7   :  { %v188_v27 = vpop.permute.xlu0 %187  ;;  %vm226_vm8 = vcmp.eq.s32.totalorder %v191_v33, 1 }
  0xa8   :  { %vm225_vm6 = vcmp.eq.s32.totalorder %v188_v27, 1  ;;  %v254_v37 = vsel %vm226_vm8, %v920_v54, %v50_v35 }
  0xa9   :  { %v253_v31 = vsel %vm225_vm6, %v920_v54, %v49_v29 }
  0xaa   :  { %675 = vmatmul.msk.f32.gmra.mxu0 %vm266_vm10, %v241_v25  ;;  %686 = vmatmul.msk.f32.gmra.mxu3 %vm266_vm10, %v252_v26 }
  0xae   :  { %v200_v58 = vpop.permute.xlu1 %199 }
  0xaf   :  { %v197_v48 = vpop.permute.xlu0 %196  ;;  %vm229_vm15 = vcmp.eq.s32.totalorder %v200_v58, 1 }
  0xb0   :  { %vm228_vm13 = vcmp.eq.s32.totalorder %v197_v48, 1  ;;  %v257_v1 = vsel %vm229_vm15, %v920_v54, %v53_v61 }
  0xb1   :  { %v256_v55 = vsel %vm228_vm13, %v920_v54, %v52_v51 }
  0xb2   :  { %676 = vmatmul.msk.f32.gmra.mxu0 %vm266_vm10, %v242_v30  ;;  %687 = vmatmul.msk.f32.gmra.mxu3 %vm266_vm10, %v253_v31 }
  0xb7   :  { %v206_v11 = vpop.permute.xlu0 %205 }
  0xb8   :  { %vm231_vm3 = vcmp.eq.s32.totalorder %v206_v11, 1 }
  0xb9   :  { %v259_v15 = vsel %vm231_vm3, %v920_v54, %v55_v13 }
  0xba   :  { %677 = vmatmul.msk.f32.gmra.mxu0 %vm266_vm10, %v243_v36  ;;  %688 = vmatmul.msk.f32.gmra.mxu3 %vm266_vm10, %v254_v37 }
  0xc2   :  { %678 = vmatmul.msk.f32.gmra.mxu0 %vm266_vm10, %v244_v44  ;;  %689 = vmatmul.msk.f32.gmra.mxu3 %vm266_vm10, %v255_v45 }
  0xca   :  { %679 = vmatmul.msk.f32.gmra.mxu0 %vm266_vm10, %v245_v53  ;;  %690 = vmatmul.msk.f32.gmra.mxu3 %vm266_vm10, %v256_v55 }
  0xd2   :  { %680 = vmatmul.msk.f32.gmra.mxu0 %vm266_vm10, %v246_v0  ;;  %691 = vmatmul.msk.f32.gmra.mxu3 %vm266_vm10, %v257_v1 }
  0xda   :  { %681 = vmatmul.msk.f32.gmra.mxu0 %vm266_vm10, %v247_v8  ;;  %692 = vmatmul.msk.f32.gmra.mxu3 %vm266_vm10, %v258_v9 }
  0xe2   :  { %682 = vmatmul.msk.f32.gmra.mxu0 %vm266_vm10, %v248_v14  ;;  %693 = vmatmul.msk.f32.gmra.mxu3 %vm266_vm10, %v259_v15 }
  0xea   :  { %683 = vmatmul.msk.f32.gmra.mxu0 %vm266_vm10, %v249_v17 }
  0xf7   :  { %v363_v19 = vpop.f32.mrf.mxu0 }
  0xf8   :  { %v364_v20 = vadd.f32 %v1116_v18, %v363_v19 }
  0xfa   :  { %v438_v21 = vmax.f32 %v364_v20, 0.0  ;;  %v1143_v20 = vld [vmem:[%s1185_s6] ss:$0 sm:$0xff]  ;;  %s765_s6 = smov [#allocation3]  }
  0xfb   :  { %s654_s13 = sshll.u32 %s765_s6, 4  ;;  %s655_s13 = int_to_ptr.vmem [resolvable:$true] %s654_s13 }
  0xfc   :  { %549 = vmatmul.f32.vlgmr.msra.gmra.mxu1 %v438_v21 }
  0xff   :  { %v366_v22 = vpop.f32.mrf.mxu0 }
 0x100   :  { %v367_v23 = vadd.f32 %v1116_v18, %v366_v22 }
 0x102   :  { %v439_v24 = vmax.f32 %v367_v23, 0.0 }
 0x104   :  { %552 = vmatmul.f32.gmra.mxu1 %v439_v24 }
 0x107   :  { %v369_v25 = vpop.f32.mrf.mxu0 }
 0x108   :  { %v370_v54 = vadd.f32 %v1116_v18, %v369_v25 }
 0x10a   :  { %v440_v26 = vmax.f32 %v370_v54, 0.0 }
 0x10c   :  { %555 = vmatmul.f32.gmra.mxu1 %v440_v26 }
 0x10f   :  { %v372_v27 = vpop.f32.mrf.mxu0 }
 0x110   :  { %v373_v28 = vadd.f32 %v1116_v18, %v372_v27 }
 0x112   :  { %v441_v29 = vmax.f32 %v373_v28, 0.0 }
 0x114   :  { %558 = vmatmul.f32.gmra.mxu1 %v441_v29 }
 0x117   :  { %v375_v30 = vpop.f32.mrf.mxu0 }
 0x118   :  { %v376_v31 = vadd.f32 %v1116_v18, %v375_v30 }
 0x11a   :  { %v442_v32 = vmax.f32 %v376_v31, 0.0 }
 0x11c   :  { %561 = vmatmul.f32.gmra.mxu1 %v442_v32 }
 0x11d   :  { %v408_v33 = vpop.f32.mrf.mxu3 }
 0x11e   :  { %v409_v16 = vadd.f32 %v1116_v18, %v408_v33 }
 0x11f   :  { %v378_v34 = vpop.f32.mrf.mxu0 }
 0x120   :  { %v379_v35 = vadd.f32 %v1116_v18, %v378_v34  ;;  %v453_v17 = vmax.f32 %v409_v16, 0.0 }
 0x122   :  { %v443_v36 = vmax.f32 %v379_v35, 0.0 }
 0x124   :  { %564 = vmatmul.f32.gmra.mxu1 %v443_v36 }
 0x125   :  { %v411_v37 = vpop.f32.mrf.mxu3 }
 0x126   :  { %v412_v19 = vadd.f32 %v1116_v18, %v411_v37 }
 0x127   :  { %v381_v38 = vpop.f32.mrf.mxu0 }
 0x128   :  { %v382_v39 = vadd.f32 %v1116_v18, %v381_v38  ;;  %v454_v22 = vmax.f32 %v412_v19, 0.0 }
 0x12a   :  { %v444_v40 = vmax.f32 %v382_v39, 0.0 }
 0x12c   :  { %567 = vmatmul.f32.gmra.mxu1 %v444_v40 }
 0x12d   :  { %v414_v41 = vpop.f32.mrf.mxu3 }
 0x12e   :  { %v415_v24 = vadd.f32 %v1116_v18, %v414_v41 }
 0x12f   :  { %v384_v42 = vpop.f32.mrf.mxu0 }
 0x130   :  { %v385_v43 = vadd.f32 %v1116_v18, %v384_v42  ;;  %v455_v54 = vmax.f32 %v415_v24, 0.0 }
 0x132   :  { %v445_v44 = vmax.f32 %v385_v43, 0.0 }
 0x134   :  { %570 = vmatmul.f32.gmra.mxu1 %v445_v44 }
 0x135   :  { %v417_v45 = vpop.f32.mrf.mxu3 }
 0x136   :  { %v418_v27 = vadd.f32 %v1116_v18, %v417_v45 }
 0x137   :  { %v387_v46 = vpop.f32.mrf.mxu0 }
 0x138   :  { %v388_v47 = vadd.f32 %v1116_v18, %v387_v46  ;;  %v456_v29 = vmax.f32 %v418_v27, 0.0 }
 0x13a   :  { %v446_v48 = vmax.f32 %v388_v47, 0.0 }
 0x13c   :  { %573 = vmatmul.f32.gmra.mxu1 %v446_v48 }
 0x13d   :  { %v420_v49 = vpop.f32.mrf.mxu3 }
 0x13e   :  { %v421_v31 = vadd.f32 %v1116_v18, %v420_v49 }
 0x13f   :  { %v390_v50 = vpop.f32.mrf.mxu0 }
 0x140   :  { %v391_v51 = vadd.f32 %v1116_v18, %v390_v50  ;;  %v457_v33 = vmax.f32 %v421_v31, 0.0 }
 0x142   :  { %v447_v52 = vmax.f32 %v391_v51, 0.0 }
 0x144   :  { %576 = vmatmul.f32.gmra.mxu1 %v447_v52 }
 0x145   :  { %v423_v53 = vpop.f32.mrf.mxu3 }
 0x146   :  { %v424_v35 = vadd.f32 %v1116_v18, %v423_v53 }
 0x147   :  { %v393_v55 = vpop.f32.mrf.mxu0 }
 0x148   :  { %v394_v56 = vadd.f32 %v1116_v18, %v393_v55  ;;  %v458_v37 = vmax.f32 %v424_v35, 0.0 }
 0x14a   :  { %v448_v57 = vmax.f32 %v394_v56, 0.0 }
 0x14c   :  { %579 = vmatmul.f32.gmra.mxu1 %v448_v57 }
 0x14d   :  { %v1129_v58 = vpop.f32.mrf.mxu3 }
 0x14e   :  { %v427_v39 = vadd.f32 %v1116_v18, %v1129_v58 }
 0x14f   :  { %v396_v59 = vpop.f32.mrf.mxu0 }
 0x150   :  { %v397_v60 = vadd.f32 %v1116_v18, %v396_v59  ;;  %v459_v41 = vmax.f32 %v427_v39, 0.0 }
 0x152   :  { %v449_v61 = vmax.f32 %v397_v60, 0.0 }
 0x154   :  { %582 = vmatmul.f32.vlgmr.msra.gmra.mxu2 %v449_v61 }
 0x155   :  { %v429_v62 = vpop.f32.mrf.mxu3 }
 0x156   :  { %v430_v63 = vadd.f32 %v1116_v18, %v429_v62 }
 0x157   :  { %v399_v0 = vpop.f32.mrf.mxu0 }
 0x158   :  { %v460_v1 = vmax.f32 %v430_v63, 0.0  ;;  %v400_v2 = vadd.f32 %v1116_v18, %v399_v0 }
 0x15a   :  { %v450_v3 = vmax.f32 %v400_v2, 0.0  ;;  %615 = vmatmul.f32.vlgmr.msrb.gmra.mxu3 %v460_v1 }
 0x15c   :  { %585 = vmatmul.f32.gmra.mxu2 %v450_v3 }
 0x15d   :  { %v432_v4 = vpop.f32.mrf.mxu3 }
 0x15e   :  { %v433_v5 = vadd.f32 %v1116_v18, %v432_v4 }
 0x15f   :  { %v402_v6 = vpop.f32.mrf.mxu0 }
 0x160   :  { %v461_v7 = vmax.f32 %v433_v5, 0.0  ;;  %v403_v8 = vadd.f32 %v1116_v18, %v402_v6 }
 0x162   :  { %v451_v9 = vmax.f32 %v403_v8, 0.0  ;;  %618 = vmatmul.f32.gmra.mxu3 %v461_v7 }
 0x164   :  { %588 = vmatmul.f32.gmra.mxu2 %v451_v9 }
 0x165   :  { %v435_v10 = vpop.f32.mrf.mxu3 }
 0x166   :  { %v436_v11 = vadd.f32 %v1116_v18, %v435_v10 }
 0x167   :  { %v405_v12 = vpop.f32.mrf.mxu0 }
 0x168   :  { %v462_v13 = vmax.f32 %v436_v11, 0.0  ;;  %v406_v14 = vadd.f32 %v1116_v18, %v405_v12 }
 0x16a   :  { %v452_v15 = vmax.f32 %v406_v14, 0.0  ;;  %621 = vmatmul.f32.gmra.mxu3 %v462_v13 }
 0x16c   :  { %591 = vmatmul.f32.gmra.mxu2 %v452_v15 }
 0x174   :  { %594 = vmatmul.f32.gmra.mxu2 %v453_v17 }
 0x179   :  { %v550_v21 = vpop.f32.mrf.mxu1 }
 0x17a   :  { %v551_v23 = vadd.f32 %v1143_v20, %v550_v21 }
 0x17c   :  { %625 = vst [vmem:[#allocation3] sm:$0xff] %v551_v23  ;;  %597 = vmatmul.f32.gmra.mxu2 %v454_v22 }
 0x181   :  { %v553_v25 = vpop.f32.mrf.mxu1 }
 0x182   :  { %v554_v26 = vadd.f32 %v1143_v20, %v553_v25 }
 0x184   :  { %626 = vst [vmem:[#allocation3 + $0x8] sm:$0xff] %v554_v26  ;;  %600 = vmatmul.f32.gmra.mxu2 %v455_v54 }
 0x189   :  { %v556_v28 = vpop.f32.mrf.mxu1 }
 0x18a   :  { %v557_v30 = vadd.f32 %v1143_v20, %v556_v28 }
 0x18c   :  { %627 = vst [vmem:[#allocation3 + $0x10] sm:$0xff] %v557_v30  ;;  %603 = vmatmul.f32.gmra.mxu2 %v456_v29 }
 0x191   :  { %v559_v32 = vpop.f32.mrf.mxu1 }
 0x192   :  { %v560_v34 = vadd.f32 %v1143_v20, %v559_v32 }
 0x194   :  { %628 = vst [vmem:[#allocation3 + $0x18] sm:$0xff] %v560_v34  ;;  %606 = vmatmul.f32.gmra.mxu2 %v457_v33 }
 0x199   :  { %v562_v36 = vpop.f32.mrf.mxu1 }
 0x19a   :  { %v563_v38 = vadd.f32 %v1143_v20, %v562_v36 }
 0x19c   :  { %629 = vst [vmem:[#allocation3 + $0x20] sm:$0xff] %v563_v38  ;;  %609 = vmatmul.f32.gmra.mxu2 %v458_v37 }
 0x1a1   :  { %v565_v40 = vpop.f32.mrf.mxu1 }
 0x1a2   :  { %v566_v42 = vadd.f32 %v1143_v20, %v565_v40 }
 0x1a4   :  { %630 = vst [vmem:[#allocation3 + $0x28] sm:$0xff] %v566_v42  ;;  %612 = vmatmul.f32.gmra.mxu2 %v459_v41 }
 0x1a9   :  { %v568_v43 = vpop.f32.mrf.mxu1 }
 0x1aa   :  { %v569_v44 = vadd.f32 %v1143_v20, %v568_v43 }
 0x1ac   :  { %631 = vst [vmem:[#allocation3 + $0x30] sm:$0xff] %v569_v44 }
 0x1b1   :  { %v571_v45 = vpop.f32.mrf.mxu1 }
 0x1b2   :  { %v572_v46 = vadd.f32 %v1143_v20, %v571_v45 }
 0x1b4   :  { %632 = vst [vmem:[#allocation3 + $0x38] sm:$0xff] %v572_v46 }
 0x1b9   :  { %v574_v47 = vpop.f32.mrf.mxu1 }
 0x1ba   :  { %v575_v48 = vadd.f32 %v1143_v20, %v574_v47 }
 0x1bc   :  { %633 = vst [vmem:[#allocation3 + $0x40] sm:$0xff] %v575_v48 }
 0x1c1   :  { %v577_v49 = vpop.f32.mrf.mxu1 }
 0x1c2   :  { %v578_v18 = vadd.f32 %v1143_v20, %v577_v49 }
 0x1c4   :  { %634 = vst [vmem:[#allocation3 + $0x48] sm:$0xff] %v578_v18 }
 0x1c9   :  { %v580_v50 = vpop.f32.mrf.mxu1 }
 0x1ca   :  { %v581_v51 = vadd.f32 %v1143_v20, %v580_v50 }
 0x1cc   :  { %635 = vst [vmem:[#allocation3 + $0x50] sm:$0xff] %v581_v51 }
 0x1d7   :  { %v583_v52 = vpop.f32.mrf.mxu2 }
 0x1d8   :  { %v584_v53 = vadd.f32 %v1143_v20, %v583_v52 }
 0x1da   :  { %636 = vst [vmem:[#allocation3 + $0x58] sm:$0xff] %v584_v53 }
 0x1dd   :  { %v616_v55 = vpop.f32.mrf.mxu3 }
 0x1de   :  { %v617_v56 = vadd.f32 %v1143_v20, %v616_v55 }
 0x1df   :  { %v586_v57 = vpop.f32.mrf.mxu2 }
 0x1e0   :  { %647 = vst [vmem:[#allocation3 + $0xb0] sm:$0xff] %v617_v56  ;;  %v587_v58 = vadd.f32 %v1143_v20, %v586_v57 }
 0x1e2   :  { %637 = vst [vmem:[#allocation3 + $0x60] sm:$0xff] %v587_v58 }
 0x1e5   :  { %v619_v59 = vpop.f32.mrf.mxu3 }
 0x1e6   :  { %v620_v60 = vadd.f32 %v1143_v20, %v619_v59 }
 0x1e7   :  { %v589_v61 = vpop.f32.mrf.mxu2 }
 0x1e8   :  { %648 = vst [vmem:[#allocation3 + $0xb8] sm:$0xff] %v620_v60  ;;  %v590_v62 = vadd.f32 %v1143_v20, %v589_v61 }
 0x1ea   :  { %638 = vst [vmem:[#allocation3 + $0x68] sm:$0xff] %v590_v62 }
 0x1ed   :  { %v622_v63 = vpop.f32.mrf.mxu3 }
 0x1ee   :  { %v623_v0 = vadd.f32 %v1143_v20, %v622_v63 }
 0x1ef   :  { %v592_v1 = vpop.f32.mrf.mxu2 }
 0x1f0   :  { %649 = vst [vmem:[#allocation3 + $0xc0] sm:$0xff] %v623_v0  ;;  %v593_v2 = vadd.f32 %v1143_v20, %v592_v1 }
 0x1f2   :  { %639 = vst [vmem:[#allocation3 + $0x70] sm:$0xff] %v593_v2 }
 0x1f7   :  { %v595_v3 = vpop.f32.mrf.mxu2 }
 0x1f8   :  { %v596_v4 = vadd.f32 %v1143_v20, %v595_v3 }
 0x1fa   :  { %640 = vst [vmem:[#allocation3 + $0x78] sm:$0xff] %v596_v4 }
 0x1ff   :  { %v598_v5 = vpop.f32.mrf.mxu2 }
 0x200   :  { %v599_v6 = vadd.f32 %v1143_v20, %v598_v5 }
 0x202   :  { %641 = vst [vmem:[#allocation3 + $0x80] sm:$0xff] %v599_v6 }
 0x207   :  { %v601_v7 = vpop.f32.mrf.mxu2 }
 0x208   :  { %v602_v8 = vadd.f32 %v1143_v20, %v601_v7 }
 0x20a   :  { %642 = vst [vmem:[#allocation3 + $0x88] sm:$0xff] %v602_v8 }
 0x20f   :  { %v604_v9 = vpop.f32.mrf.mxu2 }
 0x210   :  { %v605_v10 = vadd.f32 %v1143_v20, %v604_v9 }
 0x212   :  { %643 = vst [vmem:[#allocation3 + $0x90] sm:$0xff] %v605_v10 }
 0x217   :  { %v607_v11 = vpop.f32.mrf.mxu2 }
 0x218   :  { %v608_v12 = vadd.f32 %v1143_v20, %v607_v11 }
 0x21a   :  { %644 = vst [vmem:[#allocation3 + $0x98] sm:$0xff] %v608_v12 }
 0x21f   :  { %v610_v13 = vpop.f32.mrf.mxu2 }
 0x220   :  { %v611_v14 = vadd.f32 %v1143_v20, %v610_v13 }
 0x222   :  { %645 = vst [vmem:[#allocation3 + $0xa0] sm:$0xff] %v611_v14 }
 0x227   :  { %v613_v15 = vpop.f32.mrf.mxu2 }
 0x228   :  { %v614_v16 = vadd.f32 %v1143_v20, %v613_v15 }
 0x22a   :  { %646 = vst [vmem:[#allocation3 + $0xa8] sm:$0xff] %v614_v16 }
 0x22b   :  { %662 = dma.vmem_to_hbm [thread:$0]  %s655_s13, 3200, %s657_s16, [#allocation4], %s766_s17, %s766_s17, %s767_s18  }
 0x22c   :  { %762 = dma.done.wait [#allocation4], 3200  }
 0x22d   :  { %763 = vsyncadd [#allocation4], 4294964096 }
 0x22e   :  { %667 = vsyncpa [#allocation4], 1 }

</bundles_post_ra>
